<compile_context>
chip_gen: v7x
topology: tpu7x:2x2x1
jax: 0.10.0
libtpu: 0.0.40
codegen_flags: <defaults>
</compile_context>

<pallas_src>
import jax
import jax.numpy as jnp
from jax import lax
from jax.experimental import pallas as pl
from jax.experimental.pallas import tpu as pltpu

# ----------------------------- model hyperparameters -----------------------------
BATCH = 2
SEQ = 8
EMB = 300            # GloVe dimension (fixed by the module)
HIDDEN = 32          # hidden_dim
OUT = 4              # output_dim
N_SPECIAL = 2        # n_special_tokens
GLOVE_VOCAB = 50     # synthetic "glove" vocabulary size
VOCAB = GLOVE_VOCAB + N_SPECIAL
GATES = 4 * HIDDEN   # i, f, g, o  (= 128 lanes, one full vreg width)

# Static column offsets inside the packed MLP slabs (w_out / b_out zero-padded to HIDDEN).
OFF_IN, OFF_FC1, OFF_FC2, OFF_OUT = 0, HIDDEN, 2 * HIDDEN, 3 * HIDDEN


# ----------------------------- Pallas kernel -----------------------------
def model_kernel(
    tok_ref,      # SMEM [B*S] int32, batch-major flattened tokens (tok[b*S + t])
    gt_ref,       # VMEM [VOCAB, 4H]  precomputed emb@W_ih^T + b_ih + b_hh per token
    whh_ref,      # VMEM [H, 4H]      LSTM hidden->hidden weight (transposed), gates i,f,g,o
    wmlp_ref,     # VMEM [H, 4H]      packed MLP weights: w_in | w_fc1 | w_fc2 | w_out(pad)
    bmlp_ref,     # VMEM [1, 4H]      packed MLP biases:  b_in | b_fc1 | b_fc2 | b_out(pad)
    out_ref,      # VMEM [B, OUT]
    xg_ref,       # VMEM scratch [S*B, 4H] time-major gathered gate pre-activations
):
    H = HIDDEN

    # ---- prologue: in-kernel embedding/gate gather into packed time-major scratch ----
    # Independent of the recurrence carry, so these reads overlap the unrolled steps.
    for t in range(SEQ):
        for b in range(BATCH):
            tok = tok_ref[b * SEQ + t]
            xg_ref[pl.ds(t * BATCH + b, 1), :] = gt_ref[pl.ds(tok, 1), :]

    def activate(gates):
        # Two full-width EUP passes over the [B, 4H] vreg, then static lane slices
        # (PyTorch gate order i, f, g, o) -- instead of 4-5 narrow EUP pushes per step.
        sg = jax.nn.sigmoid(gates)
        th = jnp.tanh(gates)
        i = sg[:, 0 * H:1 * H]
        f = sg[:, 1 * H:2 * H]
        g = th[:, 2 * H:3 * H]
        o = sg[:, 3 * H:4 * H]
        return i, f, g, o

    # ---- t = 0 peeled: h_0 = c_0 = 0 => no h@W_hh term, no f*c term ----
    g0 = xg_ref[pl.ds(0, BATCH), :]
    i0, _, gg0, o0 = activate(g0)
    c = i0 * gg0
    h = o0 * jnp.tanh(c)

    w_hh = whh_ref[...]                        # hoist weight load out of the loop

    def step(t, carry):
        h, c = carry
        xg = xg_ref[pl.ds(pl.multiple_of(t * BATCH, BATCH), BATCH), :]
        gates = xg + jnp.dot(h, w_hh, preferred_element_type=jnp.float32)
        i, f, g, o = activate(gates)
        c_new = f * c + i * g
        h_new = o * jnp.tanh(c_new)
        return h_new, c_new

    h, c = lax.fori_loop(1, SEQ, step, (h, c), unroll=True)   # h == h_n as [B, H]

    # ---- ResidualMLP head (packed weight/bias slabs, static column slices) ----
    w = wmlp_ref[...]
    bias = bmlp_ref[...]

    # input_layer + ReLU
    x = jnp.dot(h, w[:, OFF_IN:OFF_IN + H],
                preferred_element_type=jnp.float32) + bias[:, OFF_IN:OFF_IN + H]
    x = jnp.maximum(x, 0.0)

    # ResidualModule: fc1 -> ReLU -> fc2 -> + residual
    res = x
    y = jnp.dot(x, w[:, OFF_FC1:OFF_FC1 + H],
                preferred_element_type=jnp.float32) + bias[:, OFF_FC1:OFF_FC1 + H]
    y = jnp.maximum(y, 0.0)
    y = jnp.dot(y, w[:, OFF_FC2:OFF_FC2 + H],
                preferred_element_type=jnp.float32) + bias[:, OFF_FC2:OFF_FC2 + H]
    x = y + res
    # TODO(synk): nn.Dropout(p=0.1) is identity in eval mode; training-mode dropout not implemented.

    # output_layer
    out_ref[...] = (
        jnp.dot(x, w[:, OFF_OUT:OFF_OUT + OUT],
                preferred_element_type=jnp.float32) + bias[:, OFF_OUT:OFF_OUT + OUT]
    )


def forward(tokens, params):
    """tokens: int32 [B, S].  Returns float32 [B, OUT]."""
    tok_flat = tokens.reshape(-1).astype(jnp.int32)   # batch-major flatten (free bitcast)

    smem = pl.BlockSpec(memory_space=pltpu.MemorySpace.SMEM)
    vmem = pl.BlockSpec(memory_space=pltpu.MemorySpace.VMEM)

    return pl.pallas_call(
        model_kernel,
        out_shape=jax.ShapeDtypeStruct((tokens.shape[0], OUT), jnp.float32),
        in_specs=[smem, vmem, vmem, vmem, vmem],
        out_specs=vmem,
        scratch_shapes=[pltpu.VMEM((SEQ * BATCH, GATES), jnp.float32)],
    )(tok_flat, params["gate_table"], params["w_hh"], params["w_mlp"], params["b_mlp"])


# ----------------------------- deterministic parameter init -----------------------------
def init_params(key):
    ks = jax.random.split(key, 14)

    def u(k, shape, fan_in):
        bound = 1.0 / jnp.sqrt(jnp.float32(fan_in))
        return jax.random.uniform(k, shape, jnp.float32, -bound, bound)

    # Synthetic GloVe table (+ special tokens), frozen.
    embedding = jax.random.normal(ks[0], (VOCAB, EMB), jnp.float32) * 0.1

    # LSTM (weights stored transposed: [in, 4H]; gate column order i, f, g, o)
    w_ih = u(ks[1], (EMB, GATES), HIDDEN)
    w_hh = u(ks[2], (HIDDEN, GATES), HIDDEN)
    b_gates = u(ks[3], (GATES,), HIDDEN) + u(ks[4], (GATES,), HIDDEN)   # b_ih + b_hh

    # ResidualMLP
    w_in = u(ks[5], (HIDDEN, HIDDEN), HIDDEN)
    b_in = u(ks[6], (HIDDEN,), HIDDEN)
    w_fc1 = u(ks[7], (HIDDEN, HIDDEN), HIDDEN)
    b_fc1 = u(ks[8], (HIDDEN,), HIDDEN)
    w_fc2 = u(ks[9], (HIDDEN, HIDDEN), HIDDEN)
    b_fc2 = u(ks[10], (HIDDEN,), HIDDEN)
    w_out = u(ks[11], (HIDDEN, OUT), HIDDEN)
    b_out = u(ks[12], (OUT,), HIDDEN)

    # One-time fold of the frozen GloVe table through the LSTM input projection (+biases).
    gate_table = embedding @ w_ih + b_gates            # [VOCAB, 4H]

    # Pack the four MLP matrices/biases into single slabs (w_out / b_out zero-padded).
    w_out_pad = jnp.zeros((HIDDEN, HIDDEN), jnp.float32).at[:, :OUT].set(w_out)
    b_out_pad = jnp.zeros((HIDDEN,), jnp.float32).at[:OUT].set(b_out)
    w_mlp = jnp.concatenate([w_in, w_fc1, w_fc2, w_out_pad], axis=1)    # [H, 4H]
    b_mlp = jnp.concatenate([b_in, b_fc1, b_fc2, b_out_pad])[None, :]   # [1, 4H]

    return {
        # raw pieces (kept only for the pure-JAX reference)
        "embedding": embedding, "w_ih": w_ih, "w_hh": w_hh, "b_gates": b_gates,
        "w_in": w_in, "b_in": b_in, "w_fc1": w_fc1, "b_fc1": b_fc1,
        "w_fc2": w_fc2, "b_fc2": b_fc2, "w_out": w_out, "b_out": b_out,
        # precomputed / packed kernel operands
        "gate_table": gate_table, "w_mlp": w_mlp, "b_mlp": b_mlp,
    }


# ----------------------------- pure-JAX reference (un-fused LSTM) -----------------------------
def reference(tokens, p):
    emb = jnp.take(p["embedding"], tokens, axis=0)             # [B, S, EMB]
    B = tokens.shape[0]
    h = jnp.zeros((B, HIDDEN), jnp.float32)
    c = jnp.zeros((B, HIDDEN), jnp.float32)
    for t in range(tokens.shape[1]):
        gates = emb[:, t, :] @ p["w_ih"] + p["b_gates"] + h @ p["w_hh"]
        i = jax.nn.sigmoid(gates[:, 0 * HIDDEN:1 * HIDDEN])
        f = jax.nn.sigmoid(gates[:, 1 * HIDDEN:2 * HIDDEN])
        g = jnp.tanh(gates[:, 2 * HIDDEN:3 * HIDDEN])
        o = jax.nn.sigmoid(gates[:, 3 * HIDDEN:4 * HIDDEN])
        c = f * c + i * g
        h = o * jnp.tanh(c)
    x = jnp.maximum(h @ p["w_in"] + p["b_in"], 0.0)
    res = x
    y = jnp.maximum(x @ p["w_fc1"] + p["b_fc1"], 0.0)
    y = y @ p["w_fc2"] + p["b_fc2"]
    x = y + res
    return x @ p["w_out"] + p["b_out"]


if __name__ == "__main__":
    key = jax.random.PRNGKey(0)
    pkey, tkey = jax.random.split(key)
    params = init_params(pkey)
    tokens = jax.random.randint(tkey, (BATCH, SEQ), 0, VOCAB, jnp.int32)

    out = forward(tokens, params)
    out = jax.block_until_ready(out)

    ref = reference(tokens, params)
    assert out.shape == (BATCH, OUT)
    assert jnp.allclose(out, ref, atol=1e-4, rtol=1e-4), "mismatch vs JAX reference"

    print("KERNEL_OK")
</pallas_src>

<mosaic_0001>
module attributes {stable_mosaic.version = 11 : i64} {
  func.func @model_kernel(%arg0: memref<16xi32, #tpu.memory_space<smem>>, %arg1: memref<52x128xf32, #tpu.memory_space<vmem>>, %arg2: memref<32x128xf32, #tpu.memory_space<vmem>>, %arg3: memref<32x128xf32, #tpu.memory_space<vmem>>, %arg4: memref<1x128xf32, #tpu.memory_space<vmem>>, %arg5: memref<2x4xf32, #tpu.memory_space<vmem>>, %arg6: memref<16x128xf32, #tpu.memory_space<vmem>>) attributes {dimension_semantics = [], scalar_prefetch = 0 : i64, scratch_operands = 1 : i64, tpu.core_type = #tpu.core_type<tc>} {
    %c0 = arith.constant 0 : index
    %0 = memref.load %arg0[%c0] : memref<16xi32, #tpu.memory_space<smem>>
    %1 = arith.index_cast %0 : i32 to index
    %c0_0 = arith.constant 0 : index
    %2 = vector.load %arg1[%1, %c0_0] : memref<52x128xf32, #tpu.memory_space<vmem>>, vector<1x128xf32>
    %c0_1 = arith.constant 0 : index
    %c0_2 = arith.constant 0 : index
    %3 = vector.load %arg6[%c0_1, %c0_2] : memref<16x128xf32, #tpu.memory_space<vmem>>, vector<1x128xf32>
    tpu.vector_store %arg6[%c0_1, %c0_2], %2 {strides = array<i32>} : memref<16x128xf32, #tpu.memory_space<vmem>>, vector<1x128xf32>,
    %c8 = arith.constant 8 : index
    %4 = memref.load %arg0[%c8] : memref<16xi32, #tpu.memory_space<smem>>
    %5 = arith.index_cast %4 : i32 to index
    %c0_3 = arith.constant 0 : index
    %6 = vector.load %arg1[%5, %c0_3] : memref<52x128xf32, #tpu.memory_space<vmem>>, vector<1x128xf32>
    %c1 = arith.constant 1 : index
    %c0_4 = arith.constant 0 : index
    %7 = vector.load %arg6[%c1, %c0_4] : memref<16x128xf32, #tpu.memory_space<vmem>>, vector<1x128xf32>
    tpu.vector_store %arg6[%c1, %c0_4], %6 {strides = array<i32>} : memref<16x128xf32, #tpu.memory_space<vmem>>, vector<1x128xf32>,
    %c1_5 = arith.constant 1 : index
    %8 = memref.load %arg0[%c1_5] : memref<16xi32, #tpu.memory_space<smem>>
    %9 = arith.index_cast %8 : i32 to index
    %c0_6 = arith.constant 0 : index
    %10 = vector.load %arg1[%9, %c0_6] : memref<52x128xf32, #tpu.memory_space<vmem>>, vector<1x128xf32>
    %c2 = arith.constant 2 : index
    %c0_7 = arith.constant 0 : index
    %11 = vector.load %arg6[%c2, %c0_7] : memref<16x128xf32, #tpu.memory_space<vmem>>, vector<1x128xf32>
    tpu.vector_store %arg6[%c2, %c0_7], %10 {strides = array<i32>} : memref<16x128xf32, #tpu.memory_space<vmem>>, vector<1x128xf32>,
    %c9 = arith.constant 9 : index
    %12 = memref.load %arg0[%c9] : memref<16xi32, #tpu.memory_space<smem>>
    %13 = arith.index_cast %12 : i32 to index
    %c0_8 = arith.constant 0 : index
    %14 = vector.load %arg1[%13, %c0_8] : memref<52x128xf32, #tpu.memory_space<vmem>>, vector<1x128xf32>
    %c3 = arith.constant 3 : index
    %c0_9 = arith.constant 0 : index
    %15 = vector.load %arg6[%c3, %c0_9] : memref<16x128xf32, #tpu.memory_space<vmem>>, vector<1x128xf32>
    tpu.vector_store %arg6[%c3, %c0_9], %14 {strides = array<i32>} : memref<16x128xf32, #tpu.memory_space<vmem>>, vector<1x128xf32>,
    %c2_10 = arith.constant 2 : index
    %16 = memref.load %arg0[%c2_10] : memref<16xi32, #tpu.memory_space<smem>>
    %17 = arith.index_cast %16 : i32 to index
    %c0_11 = arith.constant 0 : index
    %18 = vector.load %arg1[%17, %c0_11] : memref<52x128xf32, #tpu.memory_space<vmem>>, vector<1x128xf32>
    %c4 = arith.constant 4 : index
    %c0_12 = arith.constant 0 : index
    %19 = vector.load %arg6[%c4, %c0_12] : memref<16x128xf32, #tpu.memory_space<vmem>>, vector<1x128xf32>
    tpu.vector_store %arg6[%c4, %c0_12], %18 {strides = array<i32>} : memref<16x128xf32, #tpu.memory_space<vmem>>, vector<1x128xf32>,
    %c10 = arith.constant 10 : index
    %20 = memref.load %arg0[%c10] : memref<16xi32, #tpu.memory_space<smem>>
    %21 = arith.index_cast %20 : i32 to index
    %c0_13 = arith.constant 0 : index
    %22 = vector.load %arg1[%21, %c0_13] : memref<52x128xf32, #tpu.memory_space<vmem>>, vector<1x128xf32>
    %c5 = arith.constant 5 : index
    %c0_14 = arith.constant 0 : index
    %23 = vector.load %arg6[%c5, %c0_14] : memref<16x128xf32, #tpu.memory_space<vmem>>, vector<1x128xf32>
    tpu.vector_store %arg6[%c5, %c0_14], %22 {strides = array<i32>} : memref<16x128xf32, #tpu.memory_space<vmem>>, vector<1x128xf32>,
    %c3_15 = arith.constant 3 : index
    %24 = memref.load %arg0[%c3_15] : memref<16xi32, #tpu.memory_space<smem>>
    %25 = arith.index_cast %24 : i32 to index
    %c0_16 = arith.constant 0 : index
    %26 = vector.load %arg1[%25, %c0_16] : memref<52x128xf32, #tpu.memory_space<vmem>>, vector<1x128xf32>
    %c6 = arith.constant 6 : index
    %c0_17 = arith.constant 0 : index
    %27 = vector.load %arg6[%c6, %c0_17] : memref<16x128xf32, #tpu.memory_space<vmem>>, vector<1x128xf32>
    tpu.vector_store %arg6[%c6, %c0_17], %26 {strides = array<i32>} : memref<16x128xf32, #tpu.memory_space<vmem>>, vector<1x128xf32>,
    %c11 = arith.constant 11 : index
    %28 = memref.load %arg0[%c11] : memref<16xi32, #tpu.memory_space<smem>>
    %29 = arith.index_cast %28 : i32 to index
    %c0_18 = arith.constant 0 : index
    %30 = vector.load %arg1[%29, %c0_18] : memref<52x128xf32, #tpu.memory_space<vmem>>, vector<1x128xf32>
    %c7 = arith.constant 7 : index
    %c0_19 = arith.constant 0 : index
    %31 = vector.load %arg6[%c7, %c0_19] : memref<16x128xf32, #tpu.memory_space<vmem>>, vector<1x128xf32>
    tpu.vector_store %arg6[%c7, %c0_19], %30 {strides = array<i32>} : memref<16x128xf32, #tpu.memory_space<vmem>>, vector<1x128xf32>,
    %c4_20 = arith.constant 4 : index
    %32 = memref.load %arg0[%c4_20] : memref<16xi32, #tpu.memory_space<smem>>
    %33 = arith.index_cast %32 : i32 to index
    %c0_21 = arith.constant 0 : index
    %34 = vector.load %arg1[%33, %c0_21] : memref<52x128xf32, #tpu.memory_space<vmem>>, vector<1x128xf32>
    %c8_22 = arith.constant 8 : index
    %c0_23 = arith.constant 0 : index
    %35 = vector.load %arg6[%c8_22, %c0_23] : memref<16x128xf32, #tpu.memory_space<vmem>>, vector<1x128xf32>
    tpu.vector_store %arg6[%c8_22, %c0_23], %34 {strides = array<i32>} : memref<16x128xf32, #tpu.memory_space<vmem>>, vector<1x128xf32>,
    %c12 = arith.constant 12 : index
    %36 = memref.load %arg0[%c12] : memref<16xi32, #tpu.memory_space<smem>>
    %37 = arith.index_cast %36 : i32 to index
    %c0_24 = arith.constant 0 : index
    %38 = vector.load %arg1[%37, %c0_24] : memref<52x128xf32, #tpu.memory_space<vmem>>, vector<1x128xf32>
    %c9_25 = arith.constant 9 : index
    %c0_26 = arith.constant 0 : index
    %39 = vector.load %arg6[%c9_25, %c0_26] : memref<16x128xf32, #tpu.memory_space<vmem>>, vector<1x128xf32>
    tpu.vector_store %arg6[%c9_25, %c0_26], %38 {strides = array<i32>} : memref<16x128xf32, #tpu.memory_space<vmem>>, vector<1x128xf32>,
    %c5_27 = arith.constant 5 : index
    %40 = memref.load %arg0[%c5_27] : memref<16xi32, #tpu.memory_space<smem>>
    %41 = arith.index_cast %40 : i32 to index
    %c0_28 = arith.constant 0 : index
    %42 = vector.load %arg1[%41, %c0_28] : memref<52x128xf32, #tpu.memory_space<vmem>>, vector<1x128xf32>
    %c10_29 = arith.constant 10 : index
    %c0_30 = arith.constant 0 : index
    %43 = vector.load %arg6[%c10_29, %c0_30] : memref<16x128xf32, #tpu.memory_space<vmem>>, vector<1x128xf32>
    tpu.vector_store %arg6[%c10_29, %c0_30], %42 {strides = array<i32>} : memref<16x128xf32, #tpu.memory_space<vmem>>, vector<1x128xf32>,
    %c13 = arith.constant 13 : index
    %44 = memref.load %arg0[%c13] : memref<16xi32, #tpu.memory_space<smem>>
    %45 = arith.index_cast %44 : i32 to index
    %c0_31 = arith.constant 0 : index
    %46 = vector.load %arg1[%45, %c0_31] : memref<52x128xf32, #tpu.memory_space<vmem>>, vector<1x128xf32>
    %c11_32 = arith.constant 11 : index
    %c0_33 = arith.constant 0 : index
    %47 = vector.load %arg6[%c11_32, %c0_33] : memref<16x128xf32, #tpu.memory_space<vmem>>, vector<1x128xf32>
    tpu.vector_store %arg6[%c11_32, %c0_33], %46 {strides = array<i32>} : memref<16x128xf32, #tpu.memory_space<vmem>>, vector<1x128xf32>,
    %c6_34 = arith.constant 6 : index
    %48 = memref.load %arg0[%c6_34] : memref<16xi32, #tpu.memory_space<smem>>
    %49 = arith.index_cast %48 : i32 to index
    %c0_35 = arith.constant 0 : index
    %50 = vector.load %arg1[%49, %c0_35] : memref<52x128xf32, #tpu.memory_space<vmem>>, vector<1x128xf32>
    %c12_36 = arith.constant 12 : index
    %c0_37 = arith.constant 0 : index
    %51 = vector.load %arg6[%c12_36, %c0_37] : memref<16x128xf32, #tpu.memory_space<vmem>>, vector<1x128xf32>
    tpu.vector_store %arg6[%c12_36, %c0_37], %50 {strides = array<i32>} : memref<16x128xf32, #tpu.memory_space<vmem>>, vector<1x128xf32>,
    %c14 = arith.constant 14 : index
    %52 = memref.load %arg0[%c14] : memref<16xi32, #tpu.memory_space<smem>>
    %53 = arith.index_cast %52 : i32 to index
    %c0_38 = arith.constant 0 : index
    %54 = vector.load %arg1[%53, %c0_38] : memref<52x128xf32, #tpu.memory_space<vmem>>, vector<1x128xf32>
    %c13_39 = arith.constant 13 : index
    %c0_40 = arith.constant 0 : index
    %55 = vector.load %arg6[%c13_39, %c0_40] : memref<16x128xf32, #tpu.memory_space<vmem>>, vector<1x128xf32>
    tpu.vector_store %arg6[%c13_39, %c0_40], %54 {strides = array<i32>} : memref<16x128xf32, #tpu.memory_space<vmem>>, vector<1x128xf32>,
    %c7_41 = arith.constant 7 : index
    %56 = memref.load %arg0[%c7_41] : memref<16xi32, #tpu.memory_space<smem>>
    %57 = arith.index_cast %56 : i32 to index
    %c0_42 = arith.constant 0 : index
    %58 = vector.load %arg1[%57, %c0_42] : memref<52x128xf32, #tpu.memory_space<vmem>>, vector<1x128xf32>
    %c14_43 = arith.constant 14 : index
    %c0_44 = arith.constant 0 : index
    %59 = vector.load %arg6[%c14_43, %c0_44] : memref<16x128xf32, #tpu.memory_space<vmem>>, vector<1x128xf32>
    tpu.vector_store %arg6[%c14_43, %c0_44], %58 {strides = array<i32>} : memref<16x128xf32, #tpu.memory_space<vmem>>, vector<1x128xf32>,
    %c15 = arith.constant 15 : index
    %60 = memref.load %arg0[%c15] : memref<16xi32, #tpu.memory_space<smem>>
    %61 = arith.index_cast %60 : i32 to index
    %c0_45 = arith.constant 0 : index
    %62 = vector.load %arg1[%61, %c0_45] : memref<52x128xf32, #tpu.memory_space<vmem>>, vector<1x128xf32>
    %c15_46 = arith.constant 15 : index
    %c0_47 = arith.constant 0 : index
    %63 = vector.load %arg6[%c15_46, %c0_47] : memref<16x128xf32, #tpu.memory_space<vmem>>, vector<1x128xf32>
    tpu.vector_store %arg6[%c15_46, %c0_47], %62 {strides = array<i32>} : memref<16x128xf32, #tpu.memory_space<vmem>>, vector<1x128xf32>,
    %c0_48 = arith.constant 0 : index
    %c0_49 = arith.constant 0 : index
    %64 = vector.load %arg6[%c0_48, %c0_49] : memref<16x128xf32, #tpu.memory_space<vmem>>, vector<2x128xf32>
    %65 = arith.negf %64 : vector<2x128xf32>
    %66 = math.exp %65 : vector<2x128xf32>
    %cst = arith.constant 1.000000e+00 : f32
    %67 = vector.broadcast %cst : f32 to vector<2x128xf32>
    %68 = arith.addf %67, %66 : vector<2x128xf32>
    %69 = arith.divf %67, %68 : vector<2x128xf32>
    %70 = math.tanh %64 : vector<2x128xf32>
    %71 = vector.extract_strided_slice %69 {offsets = [0, 0], sizes = [2, 32], strides = [1, 1]} : vector<2x128xf32> to vector<2x32xf32>
    %72 = vector.extract_strided_slice %70 {offsets = [0, 64], sizes = [2, 32], strides = [1, 1]} : vector<2x128xf32> to vector<2x32xf32>
    %73 = vector.extract_strided_slice %69 {offsets = [0, 96], sizes = [2, 32], strides = [1, 1]} : vector<2x128xf32> to vector<2x32xf32>
    %74 = arith.mulf %71, %72 : vector<2x32xf32>
    %75 = math.tanh %74 : vector<2x32xf32>
    %76 = arith.mulf %73, %75 : vector<2x32xf32>
    %c0_50 = arith.constant 0 : index
    %c0_51 = arith.constant 0 : index
    %77 = vector.load %arg2[%c0_50, %c0_51] : memref<32x128xf32, #tpu.memory_space<vmem>>, vector<32x128xf32>
    %c1_i32 = arith.constant 1 : i32
    %c2_i32 = arith.constant 2 : i32
    %78 = arith.muli %c1_i32, %c2_i32 : i32
    %79 = tpu.assume_multiple %78, 2 : i32
    %80 = arith.index_cast %79 : i32 to index
    %c0_52 = arith.constant 0 : index
    %81 = vector.load %arg6[%80, %c0_52] : memref<16x128xf32, #tpu.memory_space<vmem>>, vector<2x128xf32>
    %cst_53 = arith.constant dense<0.000000e+00> : vector<2x128xf32>
    %82 = tpu.matmul %76, %77, %cst_53 {dimension_numbers = #tpu.dot_dimension_numbers<[1], [0], [0], [1], [0, 0, 1, 1], [], []>} : vector<2x32xf32>, vector<32x128xf32>, vector<2x128xf32> -> vector<2x128xf32>
    %83 = arith.addf %81, %82 : vector<2x128xf32>
    %84 = arith.negf %83 : vector<2x128xf32>
    %85 = math.exp %84 : vector<2x128xf32>
    %cst_54 = arith.constant 1.000000e+00 : f32
    %86 = vector.broadcast %cst_54 : f32 to vector<2x128xf32>
    %87 = arith.addf %86, %85 : vector<2x128xf32>
    %88 = arith.divf %86, %87 : vector<2x128xf32>
    %89 = math.tanh %83 : vector<2x128xf32>
    %90 = vector.extract_strided_slice %88 {offsets = [0, 0], sizes = [2, 32], strides = [1, 1]} : vector<2x128xf32> to vector<2x32xf32>
    %91 = vector.extract_strided_slice %88 {offsets = [0, 32], sizes = [2, 32], strides = [1, 1]} : vector<2x128xf32> to vector<2x32xf32>
    %92 = vector.extract_strided_slice %89 {offsets = [0, 64], sizes = [2, 32], strides = [1, 1]} : vector<2x128xf32> to vector<2x32xf32>
    %93 = vector.extract_strided_slice %88 {offsets = [0, 96], sizes = [2, 32], strides = [1, 1]} : vector<2x128xf32> to vector<2x32xf32>
    %94 = arith.mulf %91, %74 : vector<2x32xf32>
    %95 = arith.mulf %90, %92 : vector<2x32xf32>
    %96 = arith.addf %94, %95 : vector<2x32xf32>
    %97 = math.tanh %96 : vector<2x32xf32>
    %98 = arith.mulf %93, %97 : vector<2x32xf32>
    %c2_i32_55 = arith.constant 2 : i32
    %c2_i32_56 = arith.constant 2 : i32
    %99 = arith.muli %c2_i32_55, %c2_i32_56 : i32
    %100 = tpu.assume_multiple %99, 2 : i32
    %101 = arith.index_cast %100 : i32 to index
    %c0_57 = arith.constant 0 : index
    %102 = vector.load %arg6[%101, %c0_57] : memref<16x128xf32, #tpu.memory_space<vmem>>, vector<2x128xf32>
    %cst_58 = arith.constant dense<0.000000e+00> : vector<2x128xf32>
    %103 = tpu.matmul %98, %77, %cst_58 {dimension_numbers = #tpu.dot_dimension_numbers<[1], [0], [0], [1], [0, 0, 1, 1], [], []>} : vector<2x32xf32>, vector<32x128xf32>, vector<2x128xf32> -> vector<2x128xf32>
    %104 = arith.addf %102, %103 : vector<2x128xf32>
    %105 = arith.negf %104 : vector<2x128xf32>
    %106 = math.exp %105 : vector<2x128xf32>
    %cst_59 = arith.constant 1.000000e+00 : f32
    %107 = vector.broadcast %cst_59 : f32 to vector<2x128xf32>
    %108 = arith.addf %107, %106 : vector<2x128xf32>
    %109 = arith.divf %107, %108 : vector<2x128xf32>
    %110 = math.tanh %104 : vector<2x128xf32>
    %111 = vector.extract_strided_slice %109 {offsets = [0, 0], sizes = [2, 32], strides = [1, 1]} : vector<2x128xf32> to vector<2x32xf32>
    %112 = vector.extract_strided_slice %109 {offsets = [0, 32], sizes = [2, 32], strides = [1, 1]} : vector<2x128xf32> to vector<2x32xf32>
    %113 = vector.extract_strided_slice %110 {offsets = [0, 64], sizes = [2, 32], strides = [1, 1]} : vector<2x128xf32> to vector<2x32xf32>
    %114 = vector.extract_strided_slice %109 {offsets = [0, 96], sizes = [2, 32], strides = [1, 1]} : vector<2x128xf32> to vector<2x32xf32>
    %115 = arith.mulf %112, %96 : vector<2x32xf32>
    %116 = arith.mulf %111, %113 : vector<2x32xf32>
    %117 = arith.addf %115, %116 : vector<2x32xf32>
    %118 = math.tanh %117 : vector<2x32xf32>
    %119 = arith.mulf %114, %118 : vector<2x32xf32>
    %c3_i32 = arith.constant 3 : i32
    %c2_i32_60 = arith.constant 2 : i32
    %120 = arith.muli %c3_i32, %c2_i32_60 : i32
    %121 = tpu.assume_multiple %120, 2 : i32
    %122 = arith.index_cast %121 : i32 to index
    %c0_61 = arith.constant 0 : index
    %123 = vector.load %arg6[%122, %c0_61] : memref<16x128xf32, #tpu.memory_space<vmem>>, vector<2x128xf32>
    %cst_62 = arith.constant dense<0.000000e+00> : vector<2x128xf32>
    %124 = tpu.matmul %119, %77, %cst_62 {dimension_numbers = #tpu.dot_dimension_numbers<[1], [0], [0], [1], [0, 0, 1, 1], [], []>} : vector<2x32xf32>, vector<32x128xf32>, vector<2x128xf32> -> vector<2x128xf32>
    %125 = arith.addf %123, %124 : vector<2x128xf32>
    %126 = arith.negf %125 : vector<2x128xf32>
    %127 = math.exp %126 : vector<2x128xf32>
    %cst_63 = arith.constant 1.000000e+00 : f32
    %128 = vector.broadcast %cst_63 : f32 to vector<2x128xf32>
    %129 = arith.addf %128, %127 : vector<2x128xf32>
    %130 = arith.divf %128, %129 : vector<2x128xf32>
    %131 = math.tanh %125 : vector<2x128xf32>
    %132 = vector.extract_strided_slice %130 {offsets = [0, 0], sizes = [2, 32], strides = [1, 1]} : vector<2x128xf32> to vector<2x32xf32>
    %133 = vector.extract_strided_slice %130 {offsets = [0, 32], sizes = [2, 32], strides = [1, 1]} : vector<2x128xf32> to vector<2x32xf32>
    %134 = vector.extract_strided_slice %131 {offsets = [0, 64], sizes = [2, 32], strides = [1, 1]} : vector<2x128xf32> to vector<2x32xf32>
    %135 = vector.extract_strided_slice %130 {offsets = [0, 96], sizes = [2, 32], strides = [1, 1]} : vector<2x128xf32> to vector<2x32xf32>
    %136 = arith.mulf %133, %117 : vector<2x32xf32>
    %137 = arith.mulf %132, %134 : vector<2x32xf32>
    %138 = arith.addf %136, %137 : vector<2x32xf32>
    %139 = math.tanh %138 : vector<2x32xf32>
    %140 = arith.mulf %135, %139 : vector<2x32xf32>
    %c4_i32 = arith.constant 4 : i32
    %c2_i32_64 = arith.constant 2 : i32
    %141 = arith.muli %c4_i32, %c2_i32_64 : i32
    %142 = tpu.assume_multiple %141, 2 : i32
    %143 = arith.index_cast %142 : i32 to index
    %c0_65 = arith.constant 0 : index
    %144 = vector.load %arg6[%143, %c0_65] : memref<16x128xf32, #tpu.memory_space<vmem>>, vector<2x128xf32>
    %cst_66 = arith.constant dense<0.000000e+00> : vector<2x128xf32>
    %145 = tpu.matmul %140, %77, %cst_66 {dimension_numbers = #tpu.dot_dimension_numbers<[1], [0], [0], [1], [0, 0, 1, 1], [], []>} : vector<2x32xf32>, vector<32x128xf32>, vector<2x128xf32> -> vector<2x128xf32>
    %146 = arith.addf %144, %145 : vector<2x128xf32>
    %147 = arith.negf %146 : vector<2x128xf32>
    %148 = math.exp %147 : vector<2x128xf32>
    %cst_67 = arith.constant 1.000000e+00 : f32
    %149 = vector.broadcast %cst_67 : f32 to vector<2x128xf32>
    %150 = arith.addf %149, %148 : vector<2x128xf32>
    %151 = arith.divf %149, %150 : vector<2x128xf32>
    %152 = math.tanh %146 : vector<2x128xf32>
    %153 = vector.extract_strided_slice %151 {offsets = [0, 0], sizes = [2, 32], strides = [1, 1]} : vector<2x128xf32> to vector<2x32xf32>
    %154 = vector.extract_strided_slice %151 {offsets = [0, 32], sizes = [2, 32], strides = [1, 1]} : vector<2x128xf32> to vector<2x32xf32>
    %155 = vector.extract_strided_slice %152 {offsets = [0, 64], sizes = [2, 32], strides = [1, 1]} : vector<2x128xf32> to vector<2x32xf32>
    %156 = vector.extract_strided_slice %151 {offsets = [0, 96], sizes = [2, 32], strides = [1, 1]} : vector<2x128xf32> to vector<2x32xf32>
    %157 = arith.mulf %154, %138 : vector<2x32xf32>
    %158 = arith.mulf %153, %155 : vector<2x32xf32>
    %159 = arith.addf %157, %158 : vector<2x32xf32>
    %160 = math.tanh %159 : vector<2x32xf32>
    %161 = arith.mulf %156, %160 : vector<2x32xf32>
    %c5_i32 = arith.constant 5 : i32
    %c2_i32_68 = arith.constant 2 : i32
    %162 = arith.muli %c5_i32, %c2_i32_68 : i32
    %163 = tpu.assume_multiple %162, 2 : i32
    %164 = arith.index_cast %163 : i32 to index
    %c0_69 = arith.constant 0 : index
    %165 = vector.load %arg6[%164, %c0_69] : memref<16x128xf32, #tpu.memory_space<vmem>>, vector<2x128xf32>
    %cst_70 = arith.constant dense<0.000000e+00> : vector<2x128xf32>
    %166 = tpu.matmul %161, %77, %cst_70 {dimension_numbers = #tpu.dot_dimension_numbers<[1], [0], [0], [1], [0, 0, 1, 1], [], []>} : vector<2x32xf32>, vector<32x128xf32>, vector<2x128xf32> -> vector<2x128xf32>
    %167 = arith.addf %165, %166 : vector<2x128xf32>
    %168 = arith.negf %167 : vector<2x128xf32>
    %169 = math.exp %168 : vector<2x128xf32>
    %cst_71 = arith.constant 1.000000e+00 : f32
    %170 = vector.broadcast %cst_71 : f32 to vector<2x128xf32>
    %171 = arith.addf %170, %169 : vector<2x128xf32>
    %172 = arith.divf %170, %171 : vector<2x128xf32>
    %173 = math.tanh %167 : vector<2x128xf32>
    %174 = vector.extract_strided_slice %172 {offsets = [0, 0], sizes = [2, 32], strides = [1, 1]} : vector<2x128xf32> to vector<2x32xf32>
    %175 = vector.extract_strided_slice %172 {offsets = [0, 32], sizes = [2, 32], strides = [1, 1]} : vector<2x128xf32> to vector<2x32xf32>
    %176 = vector.extract_strided_slice %173 {offsets = [0, 64], sizes = [2, 32], strides = [1, 1]} : vector<2x128xf32> to vector<2x32xf32>
    %177 = vector.extract_strided_slice %172 {offsets = [0, 96], sizes = [2, 32], strides = [1, 1]} : vector<2x128xf32> to vector<2x32xf32>
    %178 = arith.mulf %175, %159 : vector<2x32xf32>
    %179 = arith.mulf %174, %176 : vector<2x32xf32>
    %180 = arith.addf %178, %179 : vector<2x32xf32>
    %181 = math.tanh %180 : vector<2x32xf32>
    %182 = arith.mulf %177, %181 : vector<2x32xf32>
    %c6_i32 = arith.constant 6 : i32
    %c2_i32_72 = arith.constant 2 : i32
    %183 = arith.muli %c6_i32, %c2_i32_72 : i32
    %184 = tpu.assume_multiple %183, 2 : i32
    %185 = arith.index_cast %184 : i32 to index
    %c0_73 = arith.constant 0 : index
    %186 = vector.load %arg6[%185, %c0_73] : memref<16x128xf32, #tpu.memory_space<vmem>>, vector<2x128xf32>
    %cst_74 = arith.constant dense<0.000000e+00> : vector<2x128xf32>
    %187 = tpu.matmul %182, %77, %cst_74 {dimension_numbers = #tpu.dot_dimension_numbers<[1], [0], [0], [1], [0, 0, 1, 1], [], []>} : vector<2x32xf32>, vector<32x128xf32>, vector<2x128xf32> -> vector<2x128xf32>
    %188 = arith.addf %186, %187 : vector<2x128xf32>
    %189 = arith.negf %188 : vector<2x128xf32>
    %190 = math.exp %189 : vector<2x128xf32>
    %cst_75 = arith.constant 1.000000e+00 : f32
    %191 = vector.broadcast %cst_75 : f32 to vector<2x128xf32>
    %192 = arith.addf %191, %190 : vector<2x128xf32>
    %193 = arith.divf %191, %192 : vector<2x128xf32>
    %194 = math.tanh %188 : vector<2x128xf32>
    %195 = vector.extract_strided_slice %193 {offsets = [0, 0], sizes = [2, 32], strides = [1, 1]} : vector<2x128xf32> to vector<2x32xf32>
    %196 = vector.extract_strided_slice %193 {offsets = [0, 32], sizes = [2, 32], strides = [1, 1]} : vector<2x128xf32> to vector<2x32xf32>
    %197 = vector.extract_strided_slice %194 {offsets = [0, 64], sizes = [2, 32], strides = [1, 1]} : vector<2x128xf32> to vector<2x32xf32>
    %198 = vector.extract_strided_slice %193 {offsets = [0, 96], sizes = [2, 32], strides = [1, 1]} : vector<2x128xf32> to vector<2x32xf32>
    %199 = arith.mulf %196, %180 : vector<2x32xf32>
    %200 = arith.mulf %195, %197 : vector<2x32xf32>
    %201 = arith.addf %199, %200 : vector<2x32xf32>
    %202 = math.tanh %201 : vector<2x32xf32>
    %203 = arith.mulf %198, %202 : vector<2x32xf32>
    %c7_i32 = arith.constant 7 : i32
    %c2_i32_76 = arith.constant 2 : i32
    %204 = arith.muli %c7_i32, %c2_i32_76 : i32
    %205 = tpu.assume_multiple %204, 2 : i32
    %206 = arith.index_cast %205 : i32 to index
    %c0_77 = arith.constant 0 : index
    %207 = vector.load %arg6[%206, %c0_77] : memref<16x128xf32, #tpu.memory_space<vmem>>, vector<2x128xf32>
    %cst_78 = arith.constant dense<0.000000e+00> : vector<2x128xf32>
    %208 = tpu.matmul %203, %77, %cst_78 {dimension_numbers = #tpu.dot_dimension_numbers<[1], [0], [0], [1], [0, 0, 1, 1], [], []>} : vector<2x32xf32>, vector<32x128xf32>, vector<2x128xf32> -> vector<2x128xf32>
    %209 = arith.addf %207, %208 : vector<2x128xf32>
    %210 = arith.negf %209 : vector<2x128xf32>
    %211 = math.exp %210 : vector<2x128xf32>
    %cst_79 = arith.constant 1.000000e+00 : f32
    %212 = vector.broadcast %cst_79 : f32 to vector<2x128xf32>
    %213 = arith.addf %212, %211 : vector<2x128xf32>
    %214 = arith.divf %212, %213 : vector<2x128xf32>
    %215 = math.tanh %209 : vector<2x128xf32>
    %216 = vector.extract_strided_slice %214 {offsets = [0, 0], sizes = [2, 32], strides = [1, 1]} : vector<2x128xf32> to vector<2x32xf32>
    %217 = vector.extract_strided_slice %214 {offsets = [0, 32], sizes = [2, 32], strides = [1, 1]} : vector<2x128xf32> to vector<2x32xf32>
    %218 = vector.extract_strided_slice %215 {offsets = [0, 64], sizes = [2, 32], strides = [1, 1]} : vector<2x128xf32> to vector<2x32xf32>
    %219 = vector.extract_strided_slice %214 {offsets = [0, 96], sizes = [2, 32], strides = [1, 1]} : vector<2x128xf32> to vector<2x32xf32>
    %220 = arith.mulf %217, %201 : vector<2x32xf32>
    %221 = arith.mulf %216, %218 : vector<2x32xf32>
    %222 = arith.addf %220, %221 : vector<2x32xf32>
    %223 = math.tanh %222 : vector<2x32xf32>
    %224 = arith.mulf %219, %223 : vector<2x32xf32>
    %c7_i32_80 = arith.constant 7 : i32
    %c0_81 = arith.constant 0 : index
    %c0_82 = arith.constant 0 : index
    %225 = vector.load %arg3[%c0_81, %c0_82] : memref<32x128xf32, #tpu.memory_space<vmem>>, vector<32x128xf32>
    %c0_83 = arith.constant 0 : index
    %c0_84 = arith.constant 0 : index
    %226 = vector.load %arg4[%c0_83, %c0_84] : memref<1x128xf32, #tpu.memory_space<vmem>>, vector<1x128xf32>
    %227 = vector.extract_strided_slice %225 {offsets = [0, 0], sizes = [32, 32], strides = [1, 1]} : vector<32x128xf32> to vector<32x32xf32>
    %cst_85 = arith.constant dense<0.000000e+00> : vector<2x32xf32>
    %228 = tpu.matmul %224, %227, %cst_85 {dimension_numbers = #tpu.dot_dimension_numbers<[1], [0], [0], [1], [0, 0, 1, 1], [], []>} : vector<2x32xf32>, vector<32x32xf32>, vector<2x32xf32> -> vector<2x32xf32>
    %229 = vector.extract_strided_slice %226 {offsets = [0, 0], sizes = [1, 32], strides = [1, 1]} : vector<1x128xf32> to vector<1x32xf32>
    %230 = vector.broadcast %229 : vector<1x32xf32> to vector<2x32xf32>
    %231 = arith.addf %228, %230 : vector<2x32xf32>
    %cst_86 = arith.constant 0.000000e+00 : f32
    %232 = vector.broadcast %cst_86 : f32 to vector<2x32xf32>
    %233 = arith.maximumf %231, %232 : vector<2x32xf32>
    %234 = vector.extract_strided_slice %225 {offsets = [0, 32], sizes = [32, 32], strides = [1, 1]} : vector<32x128xf32> to vector<32x32xf32>
    %cst_87 = arith.constant dense<0.000000e+00> : vector<2x32xf32>
    %235 = tpu.matmul %233, %234, %cst_87 {dimension_numbers = #tpu.dot_dimension_numbers<[1], [0], [0], [1], [0, 0, 1, 1], [], []>} : vector<2x32xf32>, vector<32x32xf32>, vector<2x32xf32> -> vector<2x32xf32>
    %236 = vector.extract_strided_slice %226 {offsets = [0, 32], sizes = [1, 32], strides = [1, 1]} : vector<1x128xf32> to vector<1x32xf32>
    %237 = vector.broadcast %236 : vector<1x32xf32> to vector<2x32xf32>
    %238 = arith.addf %235, %237 : vector<2x32xf32>
    %cst_88 = arith.constant 0.000000e+00 : f32
    %239 = vector.broadcast %cst_88 : f32 to vector<2x32xf32>
    %240 = arith.maximumf %238, %239 : vector<2x32xf32>
    %241 = vector.extract_strided_slice %225 {offsets = [0, 64], sizes = [32, 32], strides = [1, 1]} : vector<32x128xf32> to vector<32x32xf32>
    %cst_89 = arith.constant dense<0.000000e+00> : vector<2x32xf32>
    %242 = tpu.matmul %240, %241, %cst_89 {dimension_numbers = #tpu.dot_dimension_numbers<[1], [0], [0], [1], [0, 0, 1, 1], [], []>} : vector<2x32xf32>, vector<32x32xf32>, vector<2x32xf32> -> vector<2x32xf32>
    %243 = vector.extract_strided_slice %226 {offsets = [0, 64], sizes = [1, 32], strides = [1, 1]} : vector<1x128xf32> to vector<1x32xf32>
    %244 = vector.broadcast %243 : vector<1x32xf32> to vector<2x32xf32>
    %245 = arith.addf %242, %244 : vector<2x32xf32>
    %246 = arith.addf %245, %233 : vector<2x32xf32>
    %247 = vector.extract_strided_slice %225 {offsets = [0, 96], sizes = [32, 4], strides = [1, 1]} : vector<32x128xf32> to vector<32x4xf32>
    %cst_90 = arith.constant dense<0.000000e+00> : vector<2x4xf32>
    %248 = tpu.matmul %246, %247, %cst_90 {dimension_numbers = #tpu.dot_dimension_numbers<[1], [0], [0], [1], [0, 0, 1, 1], [], []>} : vector<2x32xf32>, vector<32x4xf32>, vector<2x4xf32> -> vector<2x4xf32>
    %249 = vector.extract_strided_slice %226 {offsets = [0, 96], sizes = [1, 4], strides = [1, 1]} : vector<1x128xf32> to vector<1x4xf32>
    %250 = vector.broadcast %249 : vector<1x4xf32> to vector<2x4xf32>
    %251 = arith.addf %248, %250 : vector<2x4xf32>
    %c0_91 = arith.constant 0 : index
    %c0_92 = arith.constant 0 : index
    %252 = vector.load %arg5[%c0_91, %c0_92] : memref<2x4xf32, #tpu.memory_space<vmem>>, vector<2x4xf32>
    tpu.vector_store %arg5[%c0_91, %c0_92], %251 {strides = array<i32>} : memref<2x4xf32, #tpu.memory_space<vmem>>, vector<2x4xf32>,
    return
  }
}

</mosaic_0001>

<bundles_post_ra>
// kernel: tpu_custom_call.1
= control target key start
LH: loop header
LB: loop body
LE: loop exit
PB: predicated region body
PF: predicated region fallthrough
CT: control target
= control target key end

     0   :  { %10 = vsyncpa [#allocation6], 0  ;;  %s1990_s0 = inlined_call_operand.hbm [shape: s32[16], index: 0, kind: input, shape index: {}]   ;;  %s1991_s1 = inlined_call_operand.hbm [shape: f32[52,128], index: 1, kind: input, shape index: {}]   ;;  %s1992_s2 = inlined_call_operand.hbm [shape: f32[32,128], index: 2, kind: input, shape index: {}]   ;;  %s1993_s3 = inlined_call_operand.hbm [shape: f32[32,128], index: 3, kind: input, shape index: {}]   ;;  %s1994_s4 = inlined_call_operand.vmem [shape: f32[1,128], index: 4, kind: input, shape index: {}]   ;;  %s1995_s5 = inlined_call_operand.hbm [shape: f32[2,4], index: 5, kind: output, shape index: {}]  }
   0x1   :  { %11 = vsyncpa [#allocation4], 0 }
   0x2   :  { %12 = vsyncpa [#allocation9], 0 }
   0x3   :  { %13 = vsyncpa [#allocation5], 0  ;;  %s1761_s18 = smov [#allocation8]   ;;  %s1762_s20 = smov [#allocation7]  }
   0x4   :  { %s39_s19 = sshll.u32 %s1761_s18, 4  ;;  %s27_s21 = sshll.u32 %s1762_s20, 4  ;;  %s40_s19 = int_to_ptr.vmem [resolvable:$true] %s39_s19  ;;  %s28_s21 = int_to_ptr.vmem [resolvable:$true] %s27_s21 }
   0x5   :  { %s1655_s24 = scalar_lea.hbm %s1992_s2, 512 }
   0x6   :  { %p1656_p0 = scmp.ne.s32.totalorder %s1992_s2, %s1655_s24  ;;  %p1659_p1 = scmp.lt.u32.totalorder %s1655_s24, %s1992_s2 }
   0x8   :  { %p1661_p2 = pnand %p1659_p1, %p1656_p0 }
   0xa   :  { %1664 = shalt.err (!%p1661_p2)
}
   0xb   :  { %s1665_s29 = scalar_lea.vmem %s40_s19, 512  ;;  %p1670_p4 = scmp.lt.s32.totalorder %s40_s19, %s40_s19 }
   0xc   :  { %p1666_p3 = scmp.ne.s32.totalorder %s40_s19, %s1665_s29  ;;  %p1671_p5 = scmp.lt.s32.totalorder %s1665_s29, %s1665_s29 }
   0xe   :  { %p1672_p6 = por %p1671_p5, %p1670_p4 }
  0x10   :  { %p1673_p7 = pnand %p1672_p6, %p1666_p3 }
  0x12   :  { %1676 = shalt.err (!%p1673_p7)
}
  0x13   :  { %s1763_s30 = smov 128   ;;  %s1764_s6 = smov 8  }
  0x14   :  { %45 = dma.hbm_to_vmem [thread:$0]  %s1992_s2, 512, %s40_s19, [#allocation9], %s1763_s30, %s1763_s30, %s1764_s6  }
  0x15   :  { %s1677_s11 = scalar_lea.hbm %s1990_s0, 16 }
  0x16   :  { %p1678_p8 = scmp.ne.s32.totalorder %s1990_s0, %s1677_s11  ;;  %p1681_p9 = scmp.lt.u32.totalorder %s1677_s11, %s1990_s0 }
  0x18   :  { %p1683_p10 = pnand %p1681_p9, %p1678_p8 }
  0x1a   :  { %1686 = shalt.err (!%p1683_p10)
}
  0x1b   :  { %s1765_s16 = smov [#allocation3]   ;;  %s1687_s20 = scalar_lea.hbm %s1991_s1, 896 }
  0x1c   :  { %21 = dma.hbm_to_smem %s1990_s0, 16, %s1765_s16, [#allocation6]  }
  0x1d   :  { %p1688_p11 = scmp.ne.s32.totalorder %s1991_s1, %s1687_s20  ;;  %p1691_p12 = scmp.lt.u32.totalorder %s1687_s20, %s1991_s1 }
  0x1f   :  { %p1693_p13 = pnand %p1691_p12, %p1688_p11 }
  0x21   :  { %1696 = shalt.err (!%p1693_p13)
}
  0x22   :  { %s1697_s26 = scalar_lea.vmem %s28_s21, 896  ;;  %p1702_p1 = scmp.lt.s32.totalorder %s28_s21, %s28_s21 }
  0x23   :  { %p1698_p0 = scmp.ne.s32.totalorder %s28_s21, %s1697_s26  ;;  %p1703_p2 = scmp.lt.s32.totalorder %s1697_s26, %s1697_s26 }
  0x25   :  { %p1704_p3 = por %p1703_p2, %p1702_p1 }
  0x27   :  { %p1705_p4 = pnand %p1704_p3, %p1698_p0 }
  0x29   :  { %1708 = shalt.err (!%p1705_p4)
}
  0x2a   :  { %33 = dma.hbm_to_vmem [thread:$0]  %s1991_s1, 896, %s28_s21, [#allocation4], %s1763_s30, %s1763_s30, %s1764_s6  }
  0x2b   :  { %s1766_s28 = smov [#allocation10]   ;;  %s1709_s9 = scalar_lea.hbm %s1993_s3, 512 }
  0x2c   :  { %s51_s29 = sshll.u32 %s1766_s28, 4  ;;  %p1710_p5 = scmp.ne.s32.totalorder %s1993_s3, %s1709_s9  ;;  %s52_s29 = int_to_ptr.vmem [resolvable:$true] %s51_s29 }
  0x2d   :  { %p1713_p6 = scmp.lt.u32.totalorder %s1709_s9, %s1993_s3 }
  0x2f   :  { %p1715_p7 = pnand %p1713_p6, %p1710_p5 }
  0x31   :  { %1718 = shalt.err (!%p1715_p7)
}
  0x32   :  { %s1719_s14 = scalar_lea.vmem %s52_s29, 512  ;;  %p1724_p9 = scmp.lt.s32.totalorder %s52_s29, %s52_s29 }
  0x33   :  { %p1720_p8 = scmp.ne.s32.totalorder %s52_s29, %s1719_s14  ;;  %p1725_p10 = scmp.lt.s32.totalorder %s1719_s14, %s1719_s14 }
  0x35   :  { %p1726_p11 = por %p1725_p10, %p1724_p9 }
  0x37   :  { %p1727_p12 = pnand %p1726_p11, %p1720_p8 }
  0x39   :  { %1730 = shalt.err (!%p1727_p12)
}
  0x3a   :  { %57 = dma.hbm_to_vmem [thread:$0]  %s1993_s3, 512, %s52_s29, [#allocation9], %s1763_s30, %s1763_s30, %s1764_s6  }
  0x3b   :  { %1753 = dma.done.wait [#allocation6], 16  }
  0x3c   :  { %1754 = vsyncadd [#allocation6], 4294967280 }
  0x3d   :  { %1755 = dma.done.wait [#allocation4], 896  }
  0x3e   :  { %1756 = vsyncadd [#allocation4], 4294966400 }
  0x3f   :  { %1757 = dma.done.wait [#allocation9], 1024  }
  0x40   :  { %1758 = vsyncadd [#allocation9], 4294966272 }
  0x41   :  { %72 = sfence }
  0x42   :  { %s73_s15 = sld [smem:[#allocation3]]  ;;  %s1767_s2 = smov 64   ;;  %v156_v10 = vld [vmem:[#allocation8] sm:$0xff]  ;;  %v157_v11 = vld [vmem:[#allocation8 + $0x8] sm:$0xff]  ;;  %v158_v12 = vld [vmem:[#allocation8 + $0x10] sm:$0xff]  ;;  %v1768_v13 = vmov 0.0|0.0  }
  0x43   :  { %s1271_s16 = sld [smem:[#allocation3 + $0x8]]  ;;  %1482 = vmatprep.subr.bf16.mxu0 %v1768_v13  ;;  %v1863_v14 = vpack.c.bf16 %v157_v11, %v156_v10  ;;  %v159_v15 = vld [vmem:[#allocation8 + $0x18] sm:$0xff]  ;;  %vm1769_vm0 = vmmov 0   ;;  %v1770_v16 = vmov 0.0   ;;  %1488 = vmatprep.subr.bf16.mxu1 %v1768_v13  ;;  %s1771_s3 = smov 96   ;;  %vm165_vm1 = vcmask 261120  }
  0x44   :  { %1369 = vmatprep.mubr.msk.f32.mxu0 %vm1769_vm0, %v1770_v16  ;;  %1380 = vmatprep.mubr.msk.f32.mxu1 %vm1769_vm0, %v1770_v16  ;;  %v1871_v17 = vpack.c.bf16 %v159_v15, %v158_v12  ;;  %s1772_s30 = smov 32   ;;  %s1272_s6 = sld [smem:[#allocation3 + $0x1]]  ;;  %vm1236_vm2 = vcmask 25600  }
  0x45   :  { %1484 = vmatpush3.bf16.msra.mxu0 %v1863_v14  ;;  %1490 = vmatpush3.bf16.msra.mxu1 %v1863_v14  ;;  %s1273_s19 = sld [smem:[#allocation3 + $0x9]]  ;;  %s1274_s23 = sld [smem:[#allocation3 + $0x2]] }
  0x46   :  { %1485 = vmatprep.subr.bf16.mxu0 %v1768_v13  ;;  %1491 = vmatprep.subr.bf16.mxu1 %v1768_v13  ;;  %s1275_s24 = sld [smem:[#allocation3 + $0xa]]  ;;  %s1276_s0 = sld [smem:[#allocation3 + $0x3]] }
  0x47   :  { %s1277_s27 = sld [smem:[#allocation3 + $0xb]]  ;;  %s1278_s7 = sld [smem:[#allocation3 + $0x4]] }
  0x48   :  { %s74_s17 = scalar_lea.vmem [#allocation7], %s73_s15  ;;  %s1279_s8 = sld [smem:[#allocation3 + $0xc]] }
  0x49   :  { %v75_v0 = vld [vmem:[%s74_s17] sm:$0x1]  ;;  %s78_s18 = scalar_lea.vmem [#allocation7], %s1271_s16  ;;  %1487 = vmatpush3.bf16.msra.mxu0 %v1871_v17  ;;  %1493 = vmatpush3.bf16.msra.mxu1 %v1871_v17  ;;  %s1280_s11 = sld [smem:[#allocation3 + $0x5]] }
  0x4a   :  { %v79_v1 = vld [vmem:[%s78_s18] sm:$0x1]  ;;  %76 = vst [vmem:[#allocation2] sm:$0x1] %v75_v0  ;;  %1494 = vmatprep.subr.bf16.mxu0 %v1768_v13  ;;  %1500 = vmatprep.subr.bf16.mxu1 %v1768_v13  ;;  %s82_s20 = scalar_lea.vmem [#allocation7], %s1272_s6  ;;  %s1281_s12 = sld [smem:[#allocation3 + $0xd]] }
  0x4b   :  { %80 = vst [vmem:[#allocation2 + $0x1] sm:$0x1] %v79_v1  ;;  %v83_v19 = vld [vmem:[%s82_s20] sm:$0x1]  ;;  %s86_s22 = scalar_lea.vmem [#allocation7], %s1273_s19  ;;  %s90_s25 = scalar_lea.vmem [#allocation7], %s1274_s23 }
  0x4c   :  { %v87_v20 = vld [vmem:[%s86_s22] sm:$0x1]  ;;  %84 = vst [vmem:[#allocation2 + $0x2] sm:$0x1] %v83_v19  ;;  %s94_s26 = scalar_lea.vmem [#allocation7], %s1275_s24  ;;  %s98_s28 = scalar_lea.vmem [#allocation7], %s1276_s0 }
  0x4d   :  { %88 = vst [vmem:[#allocation2 + $0x3] sm:$0x1] %v87_v20  ;;  %v91_v40 = vld [vmem:[%s90_s25] sm:$0x1]  ;;  %s102_s29 = scalar_lea.vmem [#allocation7], %s1277_s27  ;;  %s106_s9 = scalar_lea.vmem [#allocation7], %s1278_s7 }
  0x4e   :  { %v95_v41 = vld [vmem:[%s94_s26] sm:$0x1]  ;;  %92 = vst [vmem:[#allocation2 + $0x4] sm:$0x1] %v91_v40  ;;  %s110_s10 = scalar_lea.vmem [#allocation7], %s1279_s8  ;;  %s1282_s1 = sld [smem:[#allocation3 + $0x6]] }
  0x4f   :  { %96 = vst [vmem:[#allocation2 + $0x5] sm:$0x1] %v95_v41  ;;  %v99_v60 = vld [vmem:[%s98_s28] sm:$0x1]  ;;  %s114_s13 = scalar_lea.vmem [#allocation7], %s1280_s11  ;;  %s1283_s21 = sld [smem:[#allocation3 + $0xe]] }
  0x50   :  { %v103_v61 = vld [vmem:[%s102_s29] sm:$0x1]  ;;  %100 = vst [vmem:[#allocation2 + $0x6] sm:$0x1] %v99_v60  ;;  %s118_s14 = scalar_lea.vmem [#allocation7], %s1281_s12  ;;  %s1284_s17 = sld [smem:[#allocation3 + $0x7]] }
  0x51   :  { %104 = vst [vmem:[#allocation2 + $0x7] sm:$0x1] %v103_v61  ;;  %v107_v20 = vld [vmem:[%s106_s9] sm:$0x1]  ;;  %s1285_s18 = sld [smem:[#allocation3 + $0xf]] }
  0x52   :  { %v137_v2 = vld [vmem:[#allocation2] sm:$0x3]  ;;  %108 = vst [vmem:[#allocation2 + $0x8] sm:$0x1] %v107_v20 }
  0x53   :  { %1591 = vtanh.f32 %v137_v2  ;;  %v1286_v4 = vmul.f32 -1.442695, %v137_v2  ;;  %v115_v40 = vld [vmem:[%s114_s13] sm:$0x1] }
  0x54   :  { %v161_v24 = vld [vmem:[#allocation2 + $0x2] sm:$0x3]  ;;  %v119_v41 = vld [vmem:[%s118_s14] sm:$0x1]  ;;  %116 = vst [vmem:[#allocation2 + $0xa] sm:$0x1] %v115_v40 }
  0x55   :  { %1593 = vpow2.f32 %v1286_v4  ;;  %120 = vst [vmem:[#allocation2 + $0xb] sm:$0x1] %v119_v41  ;;  %s122_s15 = scalar_lea.vmem [#allocation7], %s1282_s1  ;;  %s126_s16 = scalar_lea.vmem [#allocation7], %s1283_s21  ;;  %v882_v41 = vld [vmem:[#allocation10 + $0x18] sm:$0xff] }
  0x56   :  { %v268_v45 = vld [vmem:[#allocation2 + $0x4] sm:$0x3]  ;;  %s130_s6 = scalar_lea.vmem [#allocation7], %s1284_s17 }
  0x57   :  { %s134_s19 = scalar_lea.vmem [#allocation7], %s1285_s18 }
  0x58   :  { %v370_v1 = vld [vmem:[#allocation2 + $0x6] sm:$0x3] }
  0x5d   :  { %v1592_v3 = vpop.eup %1591 }
  0x5e   :  { %146 = vrot.lane.b32.xlu0 %v1592_v3, %s1767_s2 }
  0x5f   :  { %v1594_v5 = vpop.eup %1593 }
  0x60   :  { %v141_v6 = vadd.f32 1.0, %v1594_v5 }
  0x62   :  { %1595 = vrcp.f32 %v141_v6 }
  0x6c   :  { %v1596_v7 = vpop.eup %1595 }
  0xd0   :  { %v147_v8 = vpop.permute.xlu0 %146 }
  0xd1   :  { %v149_v9 = vmul.f32 %v1596_v7, %v147_v8 }
  0xd3   :  { %1597 = vtanh.f32 %v149_v9 }
  0xdd   :  { %v1598_v18 = vpop.eup %1597 }
  0xde   :  { %152 = vrot.lane.b32.xlu0 %v1598_v18, %s1771_s3 }
  0xe2   :  { %247 = vrot.lane.b32.xlu0 %v149_v9, %s1772_s30 }
 0x150   :  { %v153_v21 = vpop.permute.xlu0 %152 }
 0x151   :  { %v155_v22 = vmul.f32 %v1596_v7, %v153_v21  ;;  %v111_v21 = vld [vmem:[%s110_s10] sm:$0x1] }
 0x152   :  { %112 = vst [vmem:[#allocation2 + $0x9] sm:$0x1] %v111_v21 }
 0x153   :  { %163 = vrot.lane.b32.xlu1 %v155_v22, %s1772_s30 }
 0x154   :  { %v248_v35 = vpop.permute.xlu0 %247 }
 0x1c5   :  { %v164_v23 = vpop.permute.xlu1 %163 }
 0x1c6   :  { %1370 = vmatmul.mubr.msk.f32.vlgmr.msra.gmra.mrb[0].mxu0 %vm165_vm1, %v164_v23 }
 0x1c7   :  { %1496 = vmatpush3.bf16.msra.mxu0 %v1863_v14  ;;  %1391 = vmatprep.mubr.msk.f32.mxu0 %vm1769_vm0, %v1770_v16 }
 0x1c8   :  { %1497 = vmatprep.subr.bf16.mxu0 %v1768_v13 }
 0x1cb   :  { %1499 = vmatpush3.bf16.msra.mxu0 %v1871_v17 }
 0x1cc   :  { %1506 = vmatprep.subr.bf16.mxu0 %v1768_v13 }
 0x299   :  { %v234_v25 = vpop.f32.mrb[0].mxu0 }
 0x29a   :  { %v238_v26 = vadd.f32 %v234_v25, %v161_v24  ;;  %v1371_v27 = vpop.f32.mrb[1].mxu0  ;;  %v472_v25 = vld [vmem:[#allocation2 + $0x8] sm:$0x3] }
 0x29c   :  { %1599 = vtanh.f32 %v238_v26  ;;  %v1288_v29 = vmul.f32 -1.442695, %v238_v26 }
 0x29e   :  { %1601 = vpow2.f32 %v1288_v29 }
 0x2a6   :  { %v1600_v28 = vpop.eup %1599 }
 0x2a7   :  { %252 = vrot.lane.b32.xlu1 %v1600_v28, %s1767_s2 }
 0x2a8   :  { %v1602_v30 = vpop.eup %1601 }
 0x2a9   :  { %v242_v31 = vadd.f32 1.0, %v1602_v30 }
 0x2ab   :  { %1603 = vrcp.f32 %v242_v31 }
 0x2b5   :  { %v1604_v32 = vpop.eup %1603 }
 0x2b6   :  { %v250_v36 = vmul.f32 %v1604_v32, %v248_v35 }
 0x319   :  { %v253_v33 = vpop.permute.xlu1 %252 }
 0x31a   :  { %v255_v34 = vmul.f32 %v1604_v32, %v253_v33 }
 0x31c   :  { %257 = vrot.lane.b32.xlu1 %v255_v34, %s1772_s30 }
 0x38e   :  { %v258_v37 = vpop.permute.xlu1 %257 }
 0x38f   :  { %v260_v38 = vadd.f32 %v258_v37, %v250_v36 }
 0x391   :  { %1605 = vtanh.f32 %v260_v38 }
 0x39b   :  { %v1606_v39 = vpop.eup %1605 }
 0x39c   :  { %263 = vrot.lane.b32.xlu0 %v1606_v39, %s1767_s2 }
 0x40e   :  { %v264_v42 = vpop.permute.xlu0 %263 }
 0x40f   :  { %v266_v43 = vmul.f32 %v1604_v32, %v264_v42 }
 0x411   :  { %270 = vrot.lane.b32.xlu1 %v266_v43, %s1772_s30 }
 0x483   :  { %v271_v44 = vpop.permute.xlu1 %270 }
 0x484   :  { %1381 = vmatmul.mubr.msk.f32.vlgmr.msra.gmra.mrb[0].mxu1 %vm165_vm1, %v271_v44 }
 0x485   :  { %1502 = vmatpush3.bf16.msra.mxu1 %v1863_v14  ;;  %1402 = vmatprep.mubr.msk.f32.mxu1 %vm1769_vm0, %v1770_v16 }
 0x486   :  { %1503 = vmatprep.subr.bf16.mxu1 %v1768_v13 }
 0x489   :  { %1505 = vmatpush3.bf16.msra.mxu1 %v1871_v17 }
 0x48a   :  { %1512 = vmatprep.subr.bf16.mxu1 %v1768_v13 }
 0x557   :  { %v340_v46 = vpop.f32.mrb[0].mxu1 }
 0x558   :  { %v344_v47 = vadd.f32 %v340_v46, %v268_v45  ;;  %v1382_v48 = vpop.f32.mrb[1].mxu1  ;;  %v574_v45 = vld [vmem:[#allocation2 + $0xa] sm:$0x3] }
 0x55a   :  { %1607 = vtanh.f32 %v344_v47  ;;  %v1290_v50 = vmul.f32 -1.442695, %v344_v47 }
 0x55c   :  { %1609 = vpow2.f32 %v1290_v50 }
 0x564   :  { %v1608_v49 = vpop.eup %1607 }
 0x565   :  { %354 = vrot.lane.b32.xlu0 %v1608_v49, %s1767_s2 }
 0x566   :  { %v1610_v51 = vpop.eup %1609 }
 0x567   :  { %v348_v52 = vadd.f32 1.0, %v1610_v51 }
 0x569   :  { %1611 = vrcp.f32 %v348_v52 }
 0x573   :  { %v1612_v53 = vpop.eup %1611 }
 0x574   :  { %v352_v56 = vmul.f32 %v1612_v53, %v260_v38 }
 0x5d7   :  { %v355_v54 = vpop.permute.xlu0 %354 }
 0x5d8   :  { %v357_v55 = vmul.f32 %v1612_v53, %v355_v54 }
 0x5da   :  { %359 = vrot.lane.b32.xlu1 %v357_v55, %s1772_s30 }
 0x64c   :  { %v360_v57 = vpop.permute.xlu1 %359 }
 0x64d   :  { %v362_v58 = vadd.f32 %v360_v57, %v352_v56 }
 0x64f   :  { %1613 = vtanh.f32 %v362_v58 }
 0x659   :  { %v1614_v59 = vpop.eup %1613 }
 0x65a   :  { %365 = vrot.lane.b32.xlu0 %v1614_v59, %s1767_s2  ;;  %v127_v59 = vld [vmem:[%s126_s16] sm:$0x1] }
 0x65b   :  { %128 = vst [vmem:[#allocation2 + $0xd] sm:$0x1] %v127_v59 }
 0x6cc   :  { %v366_v62 = vpop.permute.xlu0 %365 }
 0x6cd   :  { %v368_v63 = vmul.f32 %v1612_v53, %v366_v62 }
 0x6cf   :  { %372 = vrot.lane.b32.xlu1 %v368_v63, %s1772_s30 }
 0x741   :  { %v373_v0 = vpop.permute.xlu1 %372 }
 0x742   :  { %1392 = vmatmul.mubr.msk.f32.vlgmr.msra.gmra.mrb[2].mxu0 %vm165_vm1, %v373_v0 }
 0x743   :  { %1508 = vmatpush3.bf16.msra.mxu0 %v1863_v14  ;;  %1413 = vmatprep.mubr.msk.f32.mxu0 %vm1769_vm0, %v1770_v16 }
 0x744   :  { %1509 = vmatprep.subr.bf16.mxu0 %v1768_v13 }
 0x747   :  { %1511 = vmatpush3.bf16.msra.mxu0 %v1871_v17 }
 0x748   :  { %1518 = vmatprep.subr.bf16.mxu0 %v1768_v13 }
 0x815   :  { %v442_v2 = vpop.f32.mrb[2].mxu0 }
 0x816   :  { %v446_v3 = vadd.f32 %v442_v2, %v370_v1  ;;  %v1393_v4 = vpop.f32.mrb[3].mxu0 }
 0x818   :  { %1615 = vtanh.f32 %v446_v3  ;;  %v1292_v6 = vmul.f32 -1.442695, %v446_v3 }
 0x81a   :  { %1617 = vpow2.f32 %v1292_v6 }
 0x822   :  { %v1616_v5 = vpop.eup %1615 }
 0x823   :  { %456 = vrot.lane.b32.xlu0 %v1616_v5, %s1767_s2 }
 0x824   :  { %v1618_v7 = vpop.eup %1617 }
 0x825   :  { %v450_v8 = vadd.f32 1.0, %v1618_v7 }
 0x827   :  { %1619 = vrcp.f32 %v450_v8 }
 0x831   :  { %v1620_v9 = vpop.eup %1619 }
 0x832   :  { %v454_v12 = vmul.f32 %v1620_v9, %v362_v58  ;;  %v123_v58 = vld [vmem:[%s122_s15] sm:$0x1] }
 0x833   :  { %124 = vst [vmem:[#allocation2 + $0xc] sm:$0x1] %v123_v58 }
 0x83a   :  { %v676_v63 = vld [vmem:[#allocation2 + $0xc] sm:$0x3] }
 0x895   :  { %v457_v10 = vpop.permute.xlu0 %456 }
 0x896   :  { %v459_v11 = vmul.f32 %v1620_v9, %v457_v10 }
 0x898   :  { %461 = vrot.lane.b32.xlu1 %v459_v11, %s1772_s30 }
 0x90a   :  { %v462_v15 = vpop.permute.xlu1 %461 }
 0x90b   :  { %v464_v18 = vadd.f32 %v462_v15, %v454_v12 }
 0x90d   :  { %1621 = vtanh.f32 %v464_v18 }
 0x917   :  { %v1622_v19 = vpop.eup %1621 }
 0x918   :  { %467 = vrot.lane.b32.xlu0 %v1622_v19, %s1767_s2  ;;  %v135_v19 = vld [vmem:[%s134_s19] sm:$0x1] }
 0x919   :  { %136 = vst [vmem:[#allocation2 + $0xf] sm:$0x1] %v135_v19 }
 0x98a   :  { %v468_v22 = vpop.permute.xlu0 %467 }
 0x98b   :  { %v470_v23 = vmul.f32 %v1620_v9, %v468_v22 }
 0x98d   :  { %474 = vrot.lane.b32.xlu1 %v470_v23, %s1772_s30 }
 0x9ff   :  { %v475_v24 = vpop.permute.xlu1 %474 }
 0xa00   :  { %1403 = vmatmul.mubr.msk.f32.vlgmr.msra.gmra.mrb[2].mxu1 %vm165_vm1, %v475_v24 }
 0xa01   :  { %1514 = vmatpush3.bf16.msra.mxu1 %v1863_v14  ;;  %1424 = vmatprep.mubr.msk.f32.mxu1 %vm1769_vm0, %v1770_v16 }
 0xa02   :  { %1515 = vmatprep.subr.bf16.mxu1 %v1768_v13 }
 0xa05   :  { %1517 = vmatpush3.bf16.msra.mxu1 %v1871_v17 }
 0xa06   :  { %1524 = vmatprep.subr.bf16.mxu1 %v1768_v13 }
 0xad3   :  { %v544_v26 = vpop.f32.mrb[2].mxu1 }
 0xad4   :  { %v548_v27 = vadd.f32 %v544_v26, %v472_v25  ;;  %v1404_v28 = vpop.f32.mrb[3].mxu1 }
 0xad6   :  { %1623 = vtanh.f32 %v548_v27  ;;  %v1294_v30 = vmul.f32 -1.442695, %v548_v27 }
 0xad8   :  { %1625 = vpow2.f32 %v1294_v30 }
 0xae0   :  { %v1624_v29 = vpop.eup %1623 }
 0xae1   :  { %558 = vrot.lane.b32.xlu0 %v1624_v29, %s1767_s2 }
 0xae2   :  { %v1626_v31 = vpop.eup %1625 }
 0xae3   :  { %v552_v32 = vadd.f32 1.0, %v1626_v31 }
 0xae5   :  { %1627 = vrcp.f32 %v552_v32 }
 0xaef   :  { %v1628_v33 = vpop.eup %1627 }
 0xaf0   :  { %v556_v36 = vmul.f32 %v1628_v33, %v464_v18  ;;  %v131_v18 = vld [vmem:[%s130_s6] sm:$0x1] }
 0xaf1   :  { %132 = vst [vmem:[#allocation2 + $0xe] sm:$0x1] %v131_v18 }
 0xaf8   :  { %v778_v23 = vld [vmem:[#allocation2 + $0xe] sm:$0x3] }
 0xb53   :  { %v559_v34 = vpop.permute.xlu0 %558 }
 0xb54   :  { %v561_v35 = vmul.f32 %v1628_v33, %v559_v34 }
 0xb56   :  { %563 = vrot.lane.b32.xlu1 %v561_v35, %s1772_s30 }
 0xbc8   :  { %v564_v37 = vpop.permute.xlu1 %563 }
 0xbc9   :  { %v566_v38 = vadd.f32 %v564_v37, %v556_v36  ;;  %v879_v37 = vld [vmem:[#allocation10] sm:$0xff] }
 0xbcb   :  { %1629 = vtanh.f32 %v566_v38 }
 0xbd5   :  { %v1630_v39 = vpop.eup %1629 }
 0xbd6   :  { %569 = vrot.lane.b32.xlu0 %v1630_v39, %s1767_s2  ;;  %v881_v39 = vld [vmem:[#allocation10 + $0x10] sm:$0xff] }
 0xc48   :  { %v570_v42 = vpop.permute.xlu0 %569 }
 0xc49   :  { %v572_v43 = vmul.f32 %v1628_v33, %v570_v42  ;;  %v1528_v42 = vpack.c.bf16 %v882_v41, %v881_v39 }
 0xc4b   :  { %576 = vrot.lane.b32.xlu1 %v572_v43, %s1772_s30 }
 0xcbd   :  { %v577_v44 = vpop.permute.xlu1 %576 }
 0xcbe   :  { %1414 = vmatmul.mubr.msk.f32.vlgmr.msra.gmra.mrb[4].mxu0 %vm165_vm1, %v577_v44 }
 0xcbf   :  { %1520 = vmatpush3.bf16.msra.mxu0 %v1863_v14  ;;  %1435 = vmatprep.mubr.msk.f32.mxu0 %vm1769_vm0, %v1770_v16 }
 0xcc0   :  { %1521 = vmatprep.subr.bf16.mxu0 %v1768_v13 }
 0xcc3   :  { %1523 = vmatpush3.bf16.msra.mxu0 %v1871_v17 }
 0xcc4   :  { %1530 = vmatprep.subr.bf16.mxu0 %v1768_v13 }
 0xd91   :  { %v646_v46 = vpop.f32.mrb[4].mxu0 }
 0xd92   :  { %v650_v47 = vadd.f32 %v646_v46, %v574_v45  ;;  %v1415_v48 = vpop.f32.mrb[5].mxu0 }
 0xd94   :  { %1631 = vtanh.f32 %v650_v47  ;;  %v1296_v50 = vmul.f32 -1.442695, %v650_v47  ;;  %v1566_v47 = vpack.i.bf16 %v882_v41, %v881_v39 }
 0xd96   :  { %1633 = vpow2.f32 %v1296_v50 }
 0xd9e   :  { %v1632_v49 = vpop.eup %1631 }
 0xd9f   :  { %660 = vrot.lane.b32.xlu0 %v1632_v49, %s1767_s2 }
 0xda0   :  { %v1634_v14 = vpop.eup %1633 }
 0xda1   :  { %v654_v51 = vadd.f32 1.0, %v1634_v14 }
 0xda3   :  { %1635 = vrcp.f32 %v654_v51 }
 0xdad   :  { %v1636_v52 = vpop.eup %1635 }
 0xdae   :  { %v658_v17 = vmul.f32 %v1636_v52, %v566_v38  ;;  %v880_v38 = vld [vmem:[#allocation10 + $0x8] sm:$0xff] }
 0xdaf   :  { %v1525_v40 = vpack.c.bf16 %v880_v38, %v879_v37  ;;  %v1561_v44 = vpack.i.bf16 %v880_v38, %v879_v37 }
 0xe11   :  { %v661_v53 = vpop.permute.xlu0 %660 }
 0xe12   :  { %v663_v54 = vmul.f32 %v1636_v52, %v661_v53 }
 0xe14   :  { %665 = vrot.lane.b32.xlu1 %v663_v54, %s1772_s30 }
 0xe86   :  { %v666_v55 = vpop.permute.xlu1 %665 }
 0xe87   :  { %v668_v56 = vadd.f32 %v666_v55, %v658_v17  ;;  %v1301_v55 = vld [vmem:[%s1994_s4] ss:$0 sm:$0xff]  ;;  %s1773_s4 = smov [#allocation11]  }
 0xe89   :  { %1637 = vtanh.f32 %v668_v56 }
 0xe93   :  { %v1638_v57 = vpop.eup %1637 }
 0xe94   :  { %671 = vrot.lane.b32.xlu0 %v1638_v57, %s1767_s2 }
 0xf06   :  { %v672_v60 = vpop.permute.xlu0 %671 }
 0xf07   :  { %v674_v61 = vmul.f32 %v1636_v52, %v672_v60 }
 0xf09   :  { %678 = vrot.lane.b32.xlu1 %v674_v61, %s1772_s30 }
 0xf7b   :  { %v679_v62 = vpop.permute.xlu1 %678 }
 0xf7c   :  { %1425 = vmatmul.mubr.msk.f32.vlgmr.msra.gmra.mrb[4].mxu1 %vm165_vm1, %v679_v62 }
 0xf7d   :  { %1446 = vmatprep.mubr.msk.f32.mxu1 %vm1769_vm0, %v1770_v16  ;;  %1526 = vmatpush3.bf16.msra.mxu1 %v1525_v40 }
 0xf7e   :  { %1527 = vmatprep.subr.bf16.mxu1 %v1768_v13 }
 0xf81   :  { %1529 = vmatpush3.bf16.msra.mxu1 %v1528_v42 }
 0xf82   :  { %1536 = vmatprep.subr.bf16.mxu1 %v1768_v13 }
0x104f   :  { %v748_v0 = vpop.f32.mrb[4].mxu1 }
0x1050   :  { %v752_v1 = vadd.f32 %v748_v0, %v676_v63  ;;  %v1426_v2 = vpop.f32.mrb[5].mxu1 }
0x1052   :  { %1639 = vtanh.f32 %v752_v1  ;;  %v1298_v4 = vmul.f32 -1.442695, %v752_v1 }
0x1054   :  { %1641 = vpow2.f32 %v1298_v4 }
0x105c   :  { %v1640_v3 = vpop.eup %1639 }
0x105d   :  { %762 = vrot.lane.b32.xlu0 %v1640_v3, %s1767_s2 }
0x105e   :  { %v1642_v5 = vpop.eup %1641 }
0x105f   :  { %v756_v6 = vadd.f32 1.0, %v1642_v5 }
0x1061   :  { %1643 = vrcp.f32 %v756_v6 }
0x106b   :  { %v1644_v7 = vpop.eup %1643 }
0x106c   :  { %v760_v10 = vmul.f32 %v1644_v7, %v668_v56 }
0x10cf   :  { %v763_v8 = vpop.permute.xlu0 %762 }
0x10d0   :  { %v765_v9 = vmul.f32 %v1644_v7, %v763_v8 }
0x10d2   :  { %767 = vrot.lane.b32.xlu1 %v765_v9, %s1772_s30 }
0x1144   :  { %v768_v11 = vpop.permute.xlu1 %767 }
0x1145   :  { %v770_v12 = vadd.f32 %v768_v11, %v760_v10 }
0x1147   :  { %1645 = vtanh.f32 %v770_v12 }
0x1151   :  { %v1646_v15 = vpop.eup %1645 }
0x1152   :  { %773 = vrot.lane.b32.xlu0 %v1646_v15, %s1767_s2 }
0x11c4   :  { %v774_v20 = vpop.permute.xlu0 %773 }
0x11c5   :  { %v776_v21 = vmul.f32 %v1644_v7, %v774_v20 }
0x11c7   :  { %780 = vrot.lane.b32.xlu1 %v776_v21, %s1772_s30 }
0x1239   :  { %v781_v22 = vpop.permute.xlu1 %780 }
0x123a   :  { %1436 = vmatmul.mubr.msk.f32.vlgmr.msra.gmra.mrb[6].mxu0 %vm165_vm1, %v781_v22 }
0x123b   :  { %1457 = vmatprep.mubr.msk.f32.mxu0 %vm1769_vm0, %v1770_v16 }
0x130d   :  { %v850_v24 = vpop.f32.mrb[6].mxu0 }
0x130e   :  { %v854_v25 = vadd.f32 %v850_v24, %v778_v23  ;;  %v1437_v26 = vpop.f32.mrb[7].mxu0 }
0x1310   :  { %1647 = vtanh.f32 %v854_v25  ;;  %v1300_v28 = vmul.f32 -1.442695, %v854_v25 }
0x1312   :  { %1649 = vpow2.f32 %v1300_v28 }
0x131a   :  { %v1648_v27 = vpop.eup %1647 }
0x131b   :  { %864 = vrot.lane.b32.xlu0 %v1648_v27, %s1767_s2 }
0x131c   :  { %v1650_v29 = vpop.eup %1649 }
0x131d   :  { %v858_v30 = vadd.f32 1.0, %v1650_v29 }
0x131f   :  { %1651 = vrcp.f32 %v858_v30 }
0x1329   :  { %v1652_v31 = vpop.eup %1651 }
0x132a   :  { %v862_v34 = vmul.f32 %v1652_v31, %v770_v12 }
0x138d   :  { %v865_v32 = vpop.permute.xlu0 %864 }
0x138e   :  { %v867_v33 = vmul.f32 %v1652_v31, %v865_v32 }
0x1390   :  { %869 = vrot.lane.b32.xlu1 %v867_v33, %s1772_s30 }
0x1402   :  { %v870_v35 = vpop.permute.xlu1 %869 }
0x1403   :  { %v872_v36 = vadd.f32 %v870_v35, %v862_v34 }
0x1405   :  { %1653 = vtanh.f32 %v872_v36 }
0x140f   :  { %v1654_v43 = vpop.eup %1653 }
0x1410   :  { %875 = vrot.lane.b32.xlu0 %v1654_v43, %s1767_s2 }
0x1414   :  { %1562 = vrot.lane.b32.xlu0 %v1561_v44, %s1771_s3 }
0x1418   :  { %1572 = vrot.lane.b32.xlu0 %v1561_v44, %s1767_s2 }
0x141c   :  { %982 = vrot.lane.b32.xlu0 %v1301_v55, %s1771_s3 }
0x1420   :  { %1587 = vrot.lane.b32.xlu0 %v1566_v47, %s1772_s30 }
0x1424   :  { %1160 = vrot.lane.b32.xlu0 %v1301_v55, %s1772_s30 }
0x1482   :  { %v876_v45 = vpop.permute.xlu0 %875 }
0x1483   :  { %v878_v46 = vmul.f32 %v1652_v31, %v876_v45 }
0x1485   :  { %891 = vrot.lane.b32.xlu1 %v878_v46, %s1772_s30 }
0x1486   :  { %v1563_v48 = vpop.permute.xlu0 %1562 }
0x1487   :  { %v1565_v49 = vunpack.i.h.bf16 %v1563_v48  ;;  %v1564_v50 = vunpack.i.l.bf16 %v1563_v48 }
0x1489   :  { %1567 = vrot.lane.b32.xlu1 %v1566_v47, %s1771_s3  ;;  %v1531_v14 = vpack.c.bf16 %v1565_v49, %v1564_v50 }
0x148a   :  { %v1573_v56 = vpop.permute.xlu0 %1572 }
0x148b   :  { %1532 = vmatpush3.bf16.msra.mxu0 %v1531_v14  ;;  %v1575_v58 = vunpack.i.h.bf16 %v1573_v56  ;;  %v1574_v59 = vunpack.i.l.bf16 %v1573_v56 }
0x148c   :  { %1533 = vmatprep.subr.bf16.mxu0 %v1768_v13 }
0x148d   :  { %1577 = vrot.lane.b32.xlu1 %v1566_v47, %s1767_s2  ;;  %v1537_v62 = vpack.c.bf16 %v1575_v58, %v1574_v59 }
0x148e   :  { %v983_v4 = vpop.permute.xlu0 %982 }
0x1491   :  { %1582 = vrot.lane.b32.xlu1 %v1561_v44, %s1772_s30 }
0x1492   :  { %v1588_v6 = vpop.permute.xlu0 %1587 }
0x1493   :  { %v1590_v9 = vunpack.i.h.bf16 %v1588_v6  ;;  %v1589_v10 = vunpack.i.l.bf16 %v1588_v6 }
0x1495   :  { %1071 = vrot.lane.b32.xlu1 %v1301_v55, %s1767_s2  ;;  %v1546_v12 = vpack.c.bf16 %v1590_v9, %v1589_v10  ;;  %s1244_s2 = sshll.u32 %s1773_s4, 4  ;;  %s1245_s2 = int_to_ptr.vmem [resolvable:$true] %s1244_s2 }
0x1496   :  { %v1161_v25 = vpop.permute.xlu0 %1160  ;;  %s1731_s3 = scalar_lea.vmem %s1245_s2, 32  ;;  %p1736_p0 = scmp.lt.s32.totalorder %s1245_s2, %s1245_s2 }
0x1497   :  { %p1732_p13 = scmp.ne.s32.totalorder %s1245_s2, %s1731_s3  ;;  %p1737_p1 = scmp.lt.s32.totalorder %s1731_s3, %s1731_s3 }
0x1499   :  { %p1738_p2 = por %p1737_p1, %p1736_p0 }
0x149b   :  { %p1739_p3 = pnand %p1738_p2, %p1732_p13 }
0x14f7   :  { %v892_v51 = vpop.permute.xlu1 %891 }
0x14f8   :  { %1447 = vmatmul.mubr.msk.f32.vlgmr.msra.gmra.mrb[6].mxu1 %vm165_vm1, %v892_v51 }
0x14f9   :  { %1468 = vmatprep.mubr.msk.f32.mxu1 %vm1769_vm0, %v1770_v16  ;;  %1538 = vmatpush3.bf16.msra.mxu1 %v1537_v62 }
0x14fa   :  { %1539 = vmatprep.subr.bf16.mxu1 %v1768_v13 }
0x14fb   :  { %v1568_v52 = vpop.permute.xlu1 %1567 }
0x14fc   :  { %v1570_v53 = vunpack.i.h.bf16 %v1568_v52  ;;  %v1569_v54 = vunpack.i.l.bf16 %v1568_v52 }
0x14fe   :  { %v1534_v17 = vpack.c.bf16 %v1570_v53, %v1569_v54 }
0x14ff   :  { %v1578_v57 = vpop.permute.xlu1 %1577 }
0x1500   :  { %1535 = vmatpush3.bf16.msra.mxu0 %v1534_v17  ;;  %v1580_v60 = vunpack.i.h.bf16 %v1578_v57  ;;  %v1579_v61 = vunpack.i.l.bf16 %v1578_v57 }
0x1501   :  { %1542 = vmatprep.subr.bf16.mxu0 %v1768_v13 }
0x1502   :  { %v1540_v63 = vpack.c.bf16 %v1580_v60, %v1579_v61 }
0x1503   :  { %v1583_v5 = vpop.permute.xlu1 %1582 }
0x1504   :  { %1541 = vmatpush3.bf16.msra.mxu1 %v1540_v63  ;;  %v1585_v7 = vunpack.i.h.bf16 %v1583_v5  ;;  %v1584_v8 = vunpack.i.l.bf16 %v1583_v5 }
0x1506   :  { %v1543_v11 = vpack.c.bf16 %v1585_v7, %v1584_v8 }
0x1507   :  { %v1072_v20 = vpop.permute.xlu1 %1071 }
0x15cb   :  { %v961_v0 = vpop.f32.mrb[6].mxu1 }
0x15cc   :  { %v962_v1 = vadd.f32 %v1301_v55, %v961_v0  ;;  %v1448_v2 = vpop.f32.mrb[7].mxu1 }
0x15ce   :  { %v965_v3 = vmax.f32 %v962_v1, 0.0 }
0x15d0   :  { %1458 = vmatmul.mubr.msk.f32.vlgmr.msra.gmra.mrb[8].mxu0 %vm165_vm1, %v965_v3 }
0x15d1   :  { %1479 = vmatprep.mubr.msk.f32.mxu0 %vm1769_vm0, %v1770_v16  ;;  %1544 = vmatpush3.bf16.msra.mxu0 %v1543_v11 }
0x15d2   :  { %1545 = vmatprep.subr.bf16.mxu0 %v1768_v13 }
0x15d5   :  { %1547 = vmatpush3.bf16.msra.mxu0 %v1546_v12 }
0x16a3   :  { %v1054_v16 = vpop.f32.mrb[8].mxu0 }
0x16a4   :  { %v1055_v15 = vadd.f32 %v1054_v16, %v983_v4  ;;  %v1459_v18 = vpop.f32.mrb[9].mxu0 }
0x16a6   :  { %v1058_v19 = vmax.f32 %v1055_v15, 0.0 }
0x16a8   :  { %1469 = vmatmul.mubr.msk.f32.vlgmr.msra.gmra.mrb[8].mxu1 %vm165_vm1, %v1058_v19 }
0x177b   :  { %v1143_v21 = vpop.f32.mrb[8].mxu1 }
0x177c   :  { %v1144_v22 = vadd.f32 %v1143_v21, %v1072_v20  ;;  %v1470_v23 = vpop.f32.mrb[9].mxu1 }
0x177e   :  { %v1147_v24 = vadd.f32 %v1144_v22, %v965_v3 }
0x1780   :  { %1480 = vmatmul.mubr.msk.f32.vlgmr.msra.gmra.mrb[10].mxu0 %vm165_vm1, %v1147_v24 }
0x1853   :  { %v1232_v26 = vpop.f32.mrb[10].mxu0 }
0x1854   :  { %v1233_v13 = vadd.f32 %v1232_v26, %v1161_v25  ;;  %v1481_v27 = vpop.f32.mrb[11].mxu0 }
0x1856   :  { %1237 = vst.msk [vmem:[#allocation11] sm:$0x3] %vm1236_vm2, %v1233_v13 }
0x1857   :  { %1742 = shalt.err (!%p1739_p3)
}
0x1858   :  { %s1743_s24 = scalar_lea.hbm %s1995_s5, 32 }
0x1859   :  { %p1744_p4 = scmp.ne.s32.totalorder %s1995_s5, %s1743_s24  ;;  %p1747_p5 = scmp.lt.u32.totalorder %s1743_s24, %s1995_s5 }
0x185b   :  { %p1749_p6 = pnand %p1747_p5, %p1744_p4 }
0x185d   :  { %1752 = shalt.err (!%p1749_p6)
}
0x185e   :  { %1247 = dma.vmem_to_hbm [thread:$0]  %s1245_s2, 32, %s1995_s5, [#allocation5]  }
0x185f   :  { %1759 = dma.done.wait [#allocation5], 32  }
0x1860   :  { %1760 = vsyncadd [#allocation5], 4294967264 }
0x1861   :  { %1251 = vsyncpa [#allocation4], 1 }
0x1862   :  { %1252 = vsyncpa [#allocation9], 1 }
0x1863   :  { %1253 = vsyncpa [#allocation5], 1 }
0x1864   :  { %1254 = vsyncpa [#allocation6], 1 }

</bundles_post_ra>
